<compile_context>
chip_gen: v6e
topology: v6e:2x2x1
jax: 0.10.0
libtpu: 0.0.40
codegen_flags: <defaults>
</compile_context>

<pallas_src>
import functools

import numpy as np
import jax
import jax.numpy as jnp
from jax.experimental import pallas as pl
from jax.experimental.pallas import tpu as pltpu


PATCH = 4  # synthetic backbone downsampling factor


def _round_up(x, m):
    return int(pl.cdiv(x, m) * m)


# ----------------------------------------------------------------------------
# Fused backbone -> decoder -> (head + classification head) kernel
# ----------------------------------------------------------------------------
def _fused_mlp_kernel(x_ref, wbb_ref, bbb_ref, wdec_ref, bdec_ref,
                      wcat_ref, bcat_ref, o_ref):
    # x: (TM, Kin) bf16; weights bf16; biases f32; accumulate in f32.
    x = x_ref[...]
    h = jnp.dot(x, wbb_ref[...], preferred_element_type=jnp.float32)
    h = jnp.maximum(h + bbb_ref[...], 0.0)                    # backbone ReLU
    e = jnp.dot(h.astype(jnp.bfloat16), wdec_ref[...],
                preferred_element_type=jnp.float32)
    e = jnp.maximum(e + bdec_ref[...], 0.0)                   # decoder ReLU
    y = jnp.dot(e.astype(jnp.bfloat16), wcat_ref[...],
                preferred_element_type=jnp.float32)
    o_ref[...] = (y + bcat_ref[...]).astype(o_ref.dtype)      # head (+ cls)


def fused_backbone_decoder_head(xp, w_bb, b_bb, w_dec, b_dec, w_cat, b_cat,
                                *, tm=512):
    """xp:(M,Kin) bf16 -> (M, Cpad) f32, fully fused, M tiled over the grid."""
    M, kin = xp.shape
    hidden = w_bb.shape[1]
    cpad = w_cat.shape[1]

    tm = min(tm, _round_up(M, 8))
    m_pad = _round_up(M, tm)
    if m_pad != M:
        xp = jnp.pad(xp, ((0, m_pad - M), (0, 0)))

    out = pl.pallas_call(
        _fused_mlp_kernel,
        out_shape=jax.ShapeDtypeStruct((m_pad, cpad), jnp.float32),
        grid=(m_pad // tm,),
        in_specs=[
            pl.BlockSpec((tm, kin), lambda i: (i, 0)),         # activations
            pl.BlockSpec((kin, hidden), lambda i: (0, 0)),     # resident weights
            pl.BlockSpec((1, hidden), lambda i: (0, 0)),
            pl.BlockSpec((hidden, hidden), lambda i: (0, 0)),
            pl.BlockSpec((1, hidden), lambda i: (0, 0)),
            pl.BlockSpec((hidden, cpad), lambda i: (0, 0)),
            pl.BlockSpec((1, cpad), lambda i: (0, 0)),
        ],
        out_specs=pl.BlockSpec((tm, cpad), lambda i: (i, 0)),
        compiler_params=pltpu.CompilerParams(
            dimension_semantics=("parallel",)),
    )(xp, w_bb, b_bb.reshape(1, hidden), w_dec, b_dec.reshape(1, hidden),
      w_cat, b_cat.reshape(1, cpad))
    return out[:M]


# ----------------------------------------------------------------------------
# Bilinear upsample (align_corners=False) over batches of planes
# ----------------------------------------------------------------------------
def _upsample_kernel(x_ref, a_ref, bt_ref, o_ref, *, pb):
    a = a_ref[...]          # (Hout, Hin)  -- loaded once, stays in vregs
    bt = bt_ref[...]        # (Win, Wout)
    for p in range(pb):     # static unroll: PB planes per grid step
        t = jnp.dot(a, x_ref[p], preferred_element_type=jnp.float32)
        o_ref[p] = jnp.dot(t, bt,
                           preferred_element_type=jnp.float32).astype(o_ref.dtype)


def bilinear_upsample_pallas(planes, a, bt, *, pb=8):
    """planes:(P,Hin,Win) f32, a:(Hout,Hin), bt:(Win,Wout) -> (P,Hout,Wout)."""
    P, hin, win = planes.shape
    hout, wout = a.shape[0], bt.shape[1]
    pb = min(pb, P)
    p_pad = _round_up(P, pb)
    if p_pad != P:  # pad plane count so the grid divides exactly
        planes = jnp.pad(planes, ((0, p_pad - P), (0, 0), (0, 0)))

    out = pl.pallas_call(
        functools.partial(_upsample_kernel, pb=pb),
        out_shape=jax.ShapeDtypeStruct((p_pad, hout, wout), jnp.float32),
        grid=(p_pad // pb,),
        in_specs=[
            pl.BlockSpec((pb, hin, win), lambda i: (i, 0, 0)),
            pl.BlockSpec((hout, hin), lambda i: (0, 0)),
            pl.BlockSpec((win, wout), lambda i: (0, 0)),
        ],
        out_specs=pl.BlockSpec((pb, hout, wout), lambda i: (i, 0, 0)),
        compiler_params=pltpu.CompilerParams(
            dimension_semantics=("parallel",)),
    )(planes, a, bt)
    return out[:P]


# ----------------------------------------------------------------------------
# Bilinear interpolation matrices (PyTorch align_corners=False semantics)
# ----------------------------------------------------------------------------
def interp_matrix(out_size, in_size):
    i = np.arange(out_size, dtype=np.float64)
    src = (i + 0.5) * (in_size / out_size) - 0.5
    src = np.clip(src, 0.0, None)            # PyTorch clamps negative src to 0
    i0 = np.minimum(np.floor(src).astype(np.int64), in_size - 1)
    i1 = np.minimum(i0 + 1, in_size - 1)
    w1 = src - i0
    w0 = 1.0 - w1
    A = np.zeros((out_size, in_size), np.float64)
    A[np.arange(out_size), i0] += w0
    A[np.arange(out_size), i1] += w1
    return jnp.asarray(A, dtype=jnp.float32)


# ----------------------------------------------------------------------------
# ContrastiveDeeplab forward
# ----------------------------------------------------------------------------
def contrastive_deeplab_forward(x, params, *, upsample=True,
                                use_classification_head=True):
    N, C, H, W = x.shape
    H4, W4 = H // PATCH, W // PATCH
    emb_dim = params["w_head"].shape[1]

    # ---- backbone (synthetic): stride-4 patch embedding, channels-last -----
    # TODO(synk): the real backbone/decoder are injected nn.Modules; synthetic
    # stand-ins (patch-embed backbone, 1x1-conv decoder) are used here.
    xb = x.astype(jnp.bfloat16)
    xp = (
        xb.reshape(N, C, H4, PATCH, W4, PATCH)
        .transpose(0, 2, 4, 1, 3, 5)
        .reshape(N * H4 * W4, C * PATCH * PATCH)
    )

    # ---- weights: bf16 for MXU; head + classification head fused & padded ---
    w_bb = params["w_bb"].astype(jnp.bfloat16)
    w_dec = params["w_dec"].astype(jnp.bfloat16)
    if use_classification_head:
        n_cls = params["w_cls"].shape[1]
        w_cat = jnp.concatenate([params["w_head"], params["w_cls"]], axis=1)
        b_cat = jnp.concatenate(
            [params["b_head"], jnp.zeros((n_cls,), jnp.float32)])
    else:
        w_cat = params["w_head"]
        b_cat = params["b_head"]
    cout = w_cat.shape[1]
    cpad = _round_up(cout, 128)               # lane-dense (unmasked) stores
    w_cat = jnp.pad(w_cat, ((0, 0), (0, cpad - cout))).astype(jnp.bfloat16)
    b_cat = jnp.pad(b_cat, (0, cpad - cout)).astype(jnp.float32)

    # ---- fused backbone -> decoder -> head(+cls): one HBM write of (M,Cpad) -
    y = fused_backbone_decoder_head(
        xp, w_bb, params["b_bb"], w_dec, params["b_dec"], w_cat, b_cat)

    # slice lane padding off BEFORE the layout change / upsample so only the
    # real `cout` (= emb_dim+1) channels are transposed and interpolated
    y = y.reshape(N, H4, W4, cpad)[..., :cout]
    planes = jnp.transpose(y, (0, 3, 1, 2)).reshape(N * cout, H4, W4)

    # ---- bilinear upsample to input spatial size (align_corners=False) -----
    if upsample:
        A = interp_matrix(H, H4)
        Bt = interp_matrix(W, W4).T
        planes = bilinear_upsample_pallas(planes, A, Bt, pb=8)
        out_h, out_w = H, W
    else:
        out_h, out_w = H4, W4

    y_nchw = planes.reshape(N, cout, out_h, out_w)
    x_out = y_nchw[:, :emb_dim]
    if use_classification_head:
        return {"embeddings": x_out, "seg": y_nchw[:, emb_dim:]}
    return {"embeddings": x_out}


# ----------------------------------------------------------------------------
if __name__ == "__main__":
    key = jax.random.PRNGKey(0)
    N, C, H, W = 2, 4, 16, 16
    hidden, emb_dim = 32, 8

    ks = jax.random.split(key, 8)
    x = jax.random.normal(ks[0], (N, C, H, W), jnp.float32)

    params = {
        # synthetic backbone: patch-embedding weight (C*P*P, hidden)
        "w_bb": 0.1 * jax.random.normal(ks[1], (C * PATCH * PATCH, hidden), jnp.float32),
        "b_bb": 0.1 * jax.random.normal(ks[2], (hidden,), jnp.float32),
        # decoder 1x1 conv (hidden -> hidden)
        "w_dec": 0.1 * jax.random.normal(ks[3], (hidden, hidden), jnp.float32),
        "b_dec": 0.1 * jax.random.normal(ks[4], (hidden,), jnp.float32),
        # linear head: Conv2d(hidden, emb_dim, 1) with bias
        "w_head": 0.1 * jax.random.normal(ks[5], (hidden, emb_dim), jnp.float32),
        "b_head": 0.1 * jax.random.normal(ks[6], (emb_dim,), jnp.float32),
        # classification head: Conv2d(hidden, 1, 1, bias=False)
        "w_cls": 0.1 * jax.random.normal(ks[7], (hidden, 1), jnp.float32),
    }

    out = contrastive_deeplab_forward(
        x, params, upsample=True, use_classification_head=True
    )
    jax.block_until_ready(out)

    assert out["embeddings"].shape == (N, emb_dim, H, W)
    assert out["seg"].shape == (N, 1, H, W)
    assert bool(jnp.isfinite(out["embeddings"]).all())
    assert bool(jnp.isfinite(out["seg"]).all())
    print("KERNEL_OK")
</pallas_src>

<mosaic_0001>
module attributes {stable_mosaic.version = 11 : i64} {
  func.func @_fused_mlp_kernel(%arg0: i32, %arg1: memref<32x64xbf16, #tpu.memory_space<vmem>>, %arg2: memref<64x32xbf16, #tpu.memory_space<vmem>>, %arg3: memref<1x32xf32, #tpu.memory_space<vmem>>, %arg4: memref<32x32xbf16, #tpu.memory_space<vmem>>, %arg5: memref<1x32xf32, #tpu.memory_space<vmem>>, %arg6: memref<32x128xbf16, #tpu.memory_space<vmem>>, %arg7: memref<1x128xf32, #tpu.memory_space<vmem>>, %arg8: memref<32x128xf32, #tpu.memory_space<vmem>>) attributes {dimension_semantics = [#tpu.dimension_semantics<parallel>], iteration_bounds = array<i64: 1>, scalar_prefetch = 0 : i64, scratch_operands = 0 : i64, tpu.core_type = #tpu.core_type<tc>, window_params = [{transform_indices = @transform_0, window_bounds = array<i64: 32, 64>}, {pipeline_mode = #tpu.pipeline_mode<synchronous>, transform_indices = @transform_1, window_bounds = array<i64: 64, 32>}, {pipeline_mode = #tpu.pipeline_mode<synchronous>, transform_indices = @transform_2, window_bounds = array<i64: 1, 32>}, {pipeline_mode = #tpu.pipeline_mode<synchronous>, transform_indices = @transform_3, window_bounds = array<i64: 32, 32>}, {pipeline_mode = #tpu.pipeline_mode<synchronous>, transform_indices = @transform_4, window_bounds = array<i64: 1, 32>}, {pipeline_mode = #tpu.pipeline_mode<synchronous>, transform_indices = @transform_5, window_bounds = array<i64: 32, 128>}, {pipeline_mode = #tpu.pipeline_mode<synchronous>, transform_indices = @transform_6, window_bounds = array<i64: 1, 128>}, {transform_indices = @transform_7, window_bounds = array<i64: 32, 128>}]} {
    %c0 = arith.constant 0 : index
    %c0_0 = arith.constant 0 : index
    %0 = vector.load %arg1[%c0, %c0_0] : memref<32x64xbf16, #tpu.memory_space<vmem>>, vector<32x64xbf16>
    %c0_1 = arith.constant 0 : index
    %c0_2 = arith.constant 0 : index
    %1 = vector.load %arg2[%c0_1, %c0_2] : memref<64x32xbf16, #tpu.memory_space<vmem>>, vector<64x32xbf16>
    %cst = arith.constant dense<0.000000e+00> : vector<32x32xf32>
    %2 = tpu.matmul %0, %1, %cst {dimension_numbers = #tpu.dot_dimension_numbers<[1], [0], [0], [1], [0, 0, 1, 1], [], []>} : vector<32x64xbf16>, vector<64x32xbf16>, vector<32x32xf32> -> vector<32x32xf32>
    %c0_3 = arith.constant 0 : index
    %c0_4 = arith.constant 0 : index
    %3 = vector.load %arg3[%c0_3, %c0_4] : memref<1x32xf32, #tpu.memory_space<vmem>>, vector<1x32xf32>
    %4 = vector.broadcast %3 : vector<1x32xf32> to vector<32x32xf32>
    %5 = arith.addf %2, %4 : vector<32x32xf32>
    %cst_5 = arith.constant 0.000000e+00 : f32
    %6 = vector.broadcast %cst_5 : f32 to vector<32x32xf32>
    %7 = arith.maximumf %5, %6 : vector<32x32xf32>
    %8 = arith.truncf %7 : vector<32x32xf32> to vector<32x32xbf16>
    %c0_6 = arith.constant 0 : index
    %c0_7 = arith.constant 0 : index
    %9 = vector.load %arg4[%c0_6, %c0_7] : memref<32x32xbf16, #tpu.memory_space<vmem>>, vector<32x32xbf16>
    %cst_8 = arith.constant dense<0.000000e+00> : vector<32x32xf32>
    %10 = tpu.matmul %8, %9, %cst_8 {dimension_numbers = #tpu.dot_dimension_numbers<[1], [0], [0], [1], [0, 0, 1, 1], [], []>} : vector<32x32xbf16>, vector<32x32xbf16>, vector<32x32xf32> -> vector<32x32xf32>
    %c0_9 = arith.constant 0 : index
    %c0_10 = arith.constant 0 : index
    %11 = vector.load %arg5[%c0_9, %c0_10] : memref<1x32xf32, #tpu.memory_space<vmem>>, vector<1x32xf32>
    %12 = vector.broadcast %11 : vector<1x32xf32> to vector<32x32xf32>
    %13 = arith.addf %10, %12 : vector<32x32xf32>
    %cst_11 = arith.constant 0.000000e+00 : f32
    %14 = vector.broadcast %cst_11 : f32 to vector<32x32xf32>
    %15 = arith.maximumf %13, %14 : vector<32x32xf32>
    %16 = arith.truncf %15 : vector<32x32xf32> to vector<32x32xbf16>
    %c0_12 = arith.constant 0 : index
    %c0_13 = arith.constant 0 : index
    %17 = vector.load %arg6[%c0_12, %c0_13] : memref<32x128xbf16, #tpu.memory_space<vmem>>, vector<32x128xbf16>
    %cst_14 = arith.constant dense<0.000000e+00> : vector<32x128xf32>
    %18 = tpu.matmul %16, %17, %cst_14 {dimension_numbers = #tpu.dot_dimension_numbers<[1], [0], [0], [1], [0, 0, 1, 1], [], []>} : vector<32x32xbf16>, vector<32x128xbf16>, vector<32x128xf32> -> vector<32x128xf32>
    %c0_15 = arith.constant 0 : index
    %c0_16 = arith.constant 0 : index
    %19 = vector.load %arg7[%c0_15, %c0_16] : memref<1x128xf32, #tpu.memory_space<vmem>>, vector<1x128xf32>
    %20 = vector.broadcast %19 : vector<1x128xf32> to vector<32x128xf32>
    %21 = arith.addf %18, %20 : vector<32x128xf32>
    %c0_17 = arith.constant 0 : index
    %c0_18 = arith.constant 0 : index
    %22 = vector.load %arg8[%c0_17, %c0_18] : memref<32x128xf32, #tpu.memory_space<vmem>>, vector<32x128xf32>
    tpu.vector_store %arg8[%c0_17, %c0_18], %21 {strides = array<i32>} : memref<32x128xf32, #tpu.memory_space<vmem>>, vector<32x128xf32>,
    return
  }
  func.func @transform_0(%arg0: i32) -> (i32, i32) {
    %c0_i32 = arith.constant 0 : i32
    %c0_i32_0 = arith.constant 0 : i32
    return %arg0, %c0_i32 : i32, i32
  }
  func.func @transform_1(%arg0: i32) -> (i32, i32) {
    %c0_i32 = arith.constant 0 : i32
    %c0_i32_0 = arith.constant 0 : i32
    %c0_i32_1 = arith.constant 0 : i32
    return %c0_i32, %c0_i32_0 : i32, i32
  }
  func.func @transform_2(%arg0: i32) -> (i32, i32) {
    %c0_i32 = arith.constant 0 : i32
    %c0_i32_0 = arith.constant 0 : i32
    %c0_i32_1 = arith.constant 0 : i32
    return %c0_i32, %c0_i32_0 : i32, i32
  }
  func.func @transform_3(%arg0: i32) -> (i32, i32) {
    %c0_i32 = arith.constant 0 : i32
    %c0_i32_0 = arith.constant 0 : i32
    %c0_i32_1 = arith.constant 0 : i32
    return %c0_i32, %c0_i32_0 : i32, i32
  }
  func.func @transform_4(%arg0: i32) -> (i32, i32) {
    %c0_i32 = arith.constant 0 : i32
    %c0_i32_0 = arith.constant 0 : i32
    %c0_i32_1 = arith.constant 0 : i32
    return %c0_i32, %c0_i32_0 : i32, i32
  }
  func.func @transform_5(%arg0: i32) -> (i32, i32) {
    %c0_i32 = arith.constant 0 : i32
    %c0_i32_0 = arith.constant 0 : i32
    %c0_i32_1 = arith.constant 0 : i32
    return %c0_i32, %c0_i32_0 : i32, i32
  }
  func.func @transform_6(%arg0: i32) -> (i32, i32) {
    %c0_i32 = arith.constant 0 : i32
    %c0_i32_0 = arith.constant 0 : i32
    %c0_i32_1 = arith.constant 0 : i32
    return %c0_i32, %c0_i32_0 : i32, i32
  }
  func.func @transform_7(%arg0: i32) -> (i32, i32) {
    %c0_i32 = arith.constant 0 : i32
    %c0_i32_0 = arith.constant 0 : i32
    return %arg0, %c0_i32 : i32, i32
  }
}

</mosaic_0001>

<bundles_post_ra>
// kernel: tpu_custom_call.1
= control target key start
LH: loop header
LB: loop body
LE: loop exit
PB: predicated region body
PF: predicated region fallthrough
CT: control target
= control target key end

     0   :  { %vm81_vm0 = vcmask 523264   ;;  %s511_s0 = inlined_call_operand.vmem [shape: bf16[32,64], index: 0, kind: input, shape index: {}]   ;;  %s512_s1 = inlined_call_operand.vmem [shape: bf16[64,32], index: 1, kind: input, shape index: {}]   ;;  %s513_s2 = inlined_call_operand.vmem [shape: f32[1,32], index: 2, kind: input, shape index: {}]   ;;  %s514_s3 = inlined_call_operand.vmem [shape: bf16[32,32], index: 3, kind: input, shape index: {}]   ;;  %s515_s4 = inlined_call_operand.vmem [shape: f32[1,32], index: 4, kind: input, shape index: {}]   ;;  %s516_s5 = inlined_call_operand.vmem [shape: bf16[32,128], index: 5, kind: input, shape index: {}]   ;;  %s517_s6 = inlined_call_operand.vmem [shape: f32[1,128], index: 6, kind: input, shape index: {}]   ;;  %s518_s7 = inlined_call_operand.hbm [shape: f32[32,128], index: 7, kind: output, shape index: {}]  }
   0x1   :  { %v390_v0 = vld [vmem:[%s512_s1 + $0x18] sm:$0xff]   ;;  %v391_v1 = vld [vmem:[%s512_s1 + $0x10] sm:$0xff]   ;;  %v392_v2 = vld [vmem:[%s512_s1 + $0x8] sm:$0xff]  }
   0x2   :  { %359 = vmatprep.subr.bf16.mxu0 %v390_v0  ;;  %v394_v3 = vld [vmem:[%s511_s0] sm:$0xff]  }
   0x3   :  { %360 = vmatpush3.bf16.msra.mxu0 %v390_v0  ;;  %v393_v4 = vld [vmem:[%s512_s1] sm:$0xff]   ;;  %367 = vmatprep.mubr.msk.bf16.mxu0 %vm81_vm0, %v394_v3 }
   0x4   :  { %361 = vmatprep.subr.bf16.mxu0 %v391_v1 }
   0x7   :  { %362 = vmatpush3.bf16.msra.mxu0 %v391_v1 }
   0x8   :  { %363 = vmatprep.subr.bf16.mxu0 %v392_v2 }
   0x9   :  { %12 = vsyncpa [#allocation3], 0  ;;  %v395_v5 = vld [vmem:[%s511_s0 + $0x8] sm:$0xff]   ;;  %v397_v7 = vld [vmem:[%s514_s3] sm:$0xff]   ;;  %vm166_vm1 = vcmask 261120  }
   0xa   :  { %v396_v6 = vld [vmem:[%s514_s3 + $0x8] sm:$0xff]   ;;  %v326_v10 = vld [vmem:[%s513_s2] ss:$0 sm:$0xff] }
   0xb   :  { %364 = vmatpush3.bf16.msra.mxu0 %v392_v2  ;;  %371 = vmatprep.subr.bf16.mxu1 %v396_v6  ;;  %v398_v23 = vld [vmem:[%s516_s5 + $0x8] sm:$0xff]   ;;  %v399_v24 = vld [vmem:[%s516_s5] sm:$0xff]  }
   0xc   :  { %365 = vmatprep.subr.bf16.mxu0 %v393_v4  ;;  %372 = vmatpush3.bf16.msra.mxu1 %v396_v6  ;;  %v335_v27 = vld [vmem:[%s515_s4] ss:$0 sm:$0xff]  ;;  %s422_s4 = smov [#allocation2]  }
   0xd   :  { %373 = vmatprep.subr.bf16.mxu1 %v397_v7  ;;  %v340_v40 = vld [vmem:[%s517_s6] ss:$0 sm:$0xff]  ;;  %s315_s22 = sshll.u32 %s422_s4, 4  ;;  %s316_s22 = int_to_ptr.vmem [resolvable:$true] %s315_s22 }
   0xe   :  { %s400_s23 = scalar_lea.vmem %s316_s22, 512  ;;  %p405_p1 = scmp.lt.s32.totalorder %s316_s22, %s316_s22 }
   0xf   :  { %366 = vmatpush3.bf16.msra.mxu0 %v393_v4  ;;  %p401_p0 = scmp.ne.s32.totalorder %s316_s22, %s400_s23  ;;  %p406_p2 = scmp.lt.s32.totalorder %s400_s23, %s400_s23 }
  0x10   :  { %374 = vmatpush3.bf16.msra.mxu1 %v397_v7 }
  0x11   :  { %379 = vmatprep.subr.bf16.mxu1 %v398_v23  ;;  %p407_p3 = por %p406_p2, %p405_p1 }
  0x12   :  { %368 = vmatmul.mubr.msk.bf16.vlgmr.msra.gmra.mxu0 %vm81_vm0, %v395_v5 }
  0x13   :  { %p408_p4 = pnand %p407_p3, %p401_p0 }
  0xd2   :  { %v369_v8 = vpop.f32.mrf.mxu0 }
  0xd3   :  { %v131_v14 = vadd.f32 %v369_v8, %v326_v10 }
  0xd4   :  { %v122_v9 = vpop.f32.mrf.mxu0 }
  0xd5   :  { %v123_v12 = vadd.f32 %v326_v10, %v122_v9  ;;  %v139_v20 = vmax.f32 %v131_v14, 0.0 }
  0xd6   :  { %v370_v11 = vpop.f32.mrf.mxu0 }
  0xd7   :  { %v134_v13 = vadd.f32 %v370_v11, %v326_v10  ;;  %v137_v18 = vmax.f32 %v123_v12, 0.0 }
  0xd8   :  { %v125_v15 = vpop.f32.mrf.mxu0 }
  0xd9   :  { %v126_v16 = vadd.f32 %v326_v10, %v125_v15  ;;  %v140_v17 = vmax.f32 %v134_v13, 0.0 }
  0xdb   :  { %v138_v19 = vmax.f32 %v126_v16, 0.0  ;;  %v142_v22 = vpack.c.bf16 %v140_v17, %v139_v20 }
  0xdd   :  { %v141_v21 = vpack.c.bf16 %v138_v19, %v137_v18 }
  0xdf   :  { %375 = vmatprep.mubr.msk.bf16.mxu1 %vm166_vm1, %v141_v21 }
  0xe0   :  { %376 = vmatmul.mubr.msk.bf16.vlgmr.msra.gmra.mxu1 %vm166_vm1, %v142_v22 }
  0xe1   :  { %380 = vmatpush3.bf16.msra.mxu1 %v398_v23 }
  0xe2   :  { %381 = vmatprep.subr.bf16.mxu1 %v399_v24 }
  0xe5   :  { %382 = vmatpush3.bf16.msra.mxu1 %v399_v24 }
 0x1a0   :  { %v377_v25 = vpop.f32.mrf.mxu1 }
 0x1a1   :  { %v216_v31 = vadd.f32 %v377_v25, %v335_v27 }
 0x1a2   :  { %v207_v26 = vpop.f32.mrf.mxu1 }
 0x1a3   :  { %v208_v29 = vadd.f32 %v335_v27, %v207_v26  ;;  %v224_v37 = vmax.f32 %v216_v31, 0.0 }
 0x1a4   :  { %v378_v28 = vpop.f32.mrf.mxu1 }
 0x1a5   :  { %v219_v30 = vadd.f32 %v378_v28, %v335_v27  ;;  %v222_v35 = vmax.f32 %v208_v29, 0.0 }
 0x1a6   :  { %v210_v32 = vpop.f32.mrf.mxu1 }
 0x1a7   :  { %v211_v33 = vadd.f32 %v335_v27, %v210_v32  ;;  %v225_v34 = vmax.f32 %v219_v30, 0.0 }
 0x1a9   :  { %v223_v36 = vmax.f32 %v211_v33, 0.0  ;;  %v227_v39 = vpack.c.bf16 %v225_v34, %v224_v37 }
 0x1ab   :  { %v226_v38 = vpack.c.bf16 %v223_v36, %v222_v35 }
 0x1ad   :  { %383 = vmatprep.mubr.msk.bf16.mxu1 %vm166_vm1, %v226_v38 }
 0x1ae   :  { %384 = vmatmul.mubr.msk.bf16.vlgmr.msra.gmra.mxu1 %vm166_vm1, %v227_v39 }
 0x26e   :  { %v385_v41 = vpop.f32.mrf.mxu1 }
 0x26f   :  { %v300_v42 = vadd.f32 %v385_v41, %v340_v40 }
 0x270   :  { %v291_v43 = vpop.f32.mrf.mxu1 }
 0x271   :  { %308 = vst [vmem:[#allocation2 + $0x10] sm:$0xff] %v300_v42  ;;  %v292_v44 = vadd.f32 %v340_v40, %v291_v43 }
 0x272   :  { %v386_v45 = vpop.f32.mrf.mxu1 }
 0x273   :  { %306 = vst [vmem:[#allocation2] sm:$0xff] %v292_v44  ;;  %v303_v46 = vadd.f32 %v386_v45, %v340_v40 }
 0x274   :  { %v294_v47 = vpop.f32.mrf.mxu1 }
 0x275   :  { %309 = vst [vmem:[#allocation2 + $0x18] sm:$0xff] %v303_v46  ;;  %v295_v48 = vadd.f32 %v340_v40, %v294_v47 }
 0x277   :  { %307 = vst [vmem:[#allocation2 + $0x8] sm:$0xff] %v295_v48 }
 0x278   :  { %411 = shalt.err (!%p408_p4)
}
 0x279   :  { %s423_s6 = smov 128   ;;  %s424_s24 = smov 8  }
 0x27a   :  { %321 = dma.vmem_to_hbm [thread:$0]  %s316_s22, 512, %s518_s7, [#allocation3], %s423_s6, %s423_s6, %s424_s24  }
 0x27b   :  { %420 = dma.done.wait [#allocation3], 512  }
 0x27c   :  { %421 = vsyncadd [#allocation3], 4294966784 }
 0x27d   :  { %325 = vsyncpa [#allocation3], 1 }

</bundles_post_ra>
